<compile_context>
chip_gen: v5e
topology: v5e:2x2
jax: 0.10.0
libtpu: 0.0.40
codegen_flags: <defaults>
</compile_context>

<pallas_src>
import functools

import jax
import jax.numpy as jnp
from jax import lax
from jax.experimental import pallas as pl
from jax.experimental.pallas import tpu as pltpu

LANE = 128
TARGET_BLOCK_BYTES = 4 << 20        # ~4 MiB per input block (perf review #2)
VMEM_CAP_BYTES = 48 << 20           # stay well under v7x's 64 MiB physical VMEM
VMEM_SLACK_BYTES = 4 << 20          # headroom for Mosaic internal scratch
DEFAULT_MIN_KERNEL_ELEMS = 1 << 20  # below this, pure-JAX path wins


def _row_align(dtype) -> int:
    """Sublane-packing row alignment: f32 -> 8, bf16 -> 16, int8/bool -> 32."""
    itemsize = jnp.dtype(dtype).itemsize
    return max(8, 8 * (4 // max(1, itemsize)))


def _dice_sums_ref(preds, targets):
    """Per-sample (intersection, p_sum + t_sum) in plain JAX (fast path / ref)."""
    b = preds.shape[0]
    p = jax.nn.sigmoid(preds.astype(jnp.float32).reshape(b, -1))
    t = targets.astype(jnp.float32).reshape(b, -1)
    return jnp.sum(p * t, axis=1), jnp.sum(p, axis=1) + jnp.sum(t, axis=1)


def _dice_kernel(p_ref, t_ref, inter_ref, pt_ref, *, tm, n_valid, need_mask):
    """Accumulate per-sample partial sums for one (B, tm, 128) feature tile."""
    k = pl.program_id(0)

    @pl.when(k == 0)
    def _init():
        inter_ref[...] = jnp.zeros_like(inter_ref)
        pt_ref[...] = jnp.zeros_like(pt_ref)

    x = p_ref[...].astype(jnp.float32)
    t = t_ref[...].astype(jnp.float32)
    # Single-transcendental sigmoid: sigmoid(x) = 0.5 * (tanh(x / 2) + 1).
    p = 0.5 * (jnp.tanh(0.5 * x) + 1.0)

    if need_mask:
        # Flat per-sample feature index of every element in this tile; padded /
        # out-of-bounds elements contribute 0 regardless of their raw value.
        # (int32 flat index: fine for any realistic per-sample feature count.)
        rows = lax.broadcasted_iota(jnp.int32, x.shape, 1)
        lanes = lax.broadcasted_iota(jnp.int32, x.shape, 2)
        flat = (k * tm + rows) * LANE + lanes
        valid = flat < n_valid
        p = jnp.where(valid, p, 0.0)
        t = jnp.where(valid, t, 0.0)

    b = x.shape[0]
    # Full-vreg accumulators: reduce groups of 8 rows with pure VPU vreg adds;
    # the remaining sublane/lane reduction happens in the JAX epilogue.
    inter_ref[...] += jnp.sum((p * t).reshape(b, tm // 8, 8, LANE), axis=1)
    pt_ref[...] += jnp.sum((p + t).reshape(b, tm // 8, 8, LANE), axis=1)


def dice_loss(preds, targets, smooth=1e-6, *,
              min_kernel_elems=DEFAULT_MIN_KERNEL_ELEMS,
              target_block_bytes=TARGET_BLOCK_BYTES):
    """Pallas implementation of DiceLoss.forward (returns a scalar)."""
    assert preds.shape == targets.shape
    b = preds.shape[0]
    n = 1
    for d in preds.shape[1:]:
        n *= d

    p_item = jnp.dtype(preds.dtype).itemsize
    t_item = jnp.dtype(targets.dtype).itemsize
    row_align = max(_row_align(preds.dtype), _row_align(targets.dtype))

    # Rows per block: ~target_block_bytes for the widest input, aligned to the
    # sublane packing, capped so 2 inputs x 2 pipeline buffers fit the budget.
    tm_target = target_block_bytes // (b * LANE * max(p_item, t_item))
    tm_vmem = (VMEM_CAP_BYTES - VMEM_SLACK_BYTES) // (2 * b * LANE * (p_item + t_item))
    tm = min(tm_target, tm_vmem) // row_align * row_align

    use_kernel = (b * n >= min_kernel_elems) and tm >= row_align
    if not use_kernel:
        # Small-input (or oversized-batch) fast path: fused XLA reduction.
        inter_b, pt_b = _dice_sums_ref(preds, targets)
        return 1.0 - jnp.mean(2.0 * inter_b / (pt_b + smooth))

    # Sublane/lane-dense layout: (B, R, 128) with R a multiple of row_align.
    # Padding (one extra HBM pass) only triggers for ragged N; the pad value is
    # irrelevant because padded elements are masked inside the kernel.
    chunk = LANE * row_align
    n_pad = -(-n // chunk) * chunk
    r = n_pad // LANE

    p2 = preds.reshape(b, n)
    t2 = targets.reshape(b, n)
    if n_pad != n:
        p2 = jnp.pad(p2, ((0, 0), (0, n_pad - n)))
        t2 = jnp.pad(t2, ((0, 0), (0, n_pad - n)))
    p3 = p2.reshape(b, r, LANE)
    t3 = t2.reshape(b, r, LANE)

    tm = min(tm, r)                       # both multiples of row_align
    steps = -(-r // tm)
    need_mask = (steps * tm * LANE) != n  # any pad or OOB rows in last block?

    # Explicit, footprint-based VMEM budget.
    block_bytes = b * tm * LANE * (p_item + t_item)     # one buffer set
    out_bytes = 2 * b * 8 * LANE * 4                    # both accumulators
    vmem_limit = int(min(VMEM_CAP_BYTES,
                         max(16 << 20,
                             2 * block_bytes + 2 * out_bytes + VMEM_SLACK_BYTES)))

    kernel = functools.partial(_dice_kernel, tm=tm, n_valid=n, need_mask=need_mask)
    in_map = lambda k: (0, k, 0)
    out_map = lambda k: (0, 0, 0)

    inter, pt = pl.pallas_call(
        kernel,
        out_shape=(
            jax.ShapeDtypeStruct((b, 8, LANE), jnp.float32),
            jax.ShapeDtypeStruct((b, 8, LANE), jnp.float32),
        ),
        grid_spec=pltpu.PrefetchScalarGridSpec(
            num_scalar_prefetch=0,
            grid=(steps,),
            in_specs=[
                pl.BlockSpec((b, tm, LANE), in_map),
                pl.BlockSpec((b, tm, LANE), in_map),
            ],
            out_specs=(
                pl.BlockSpec((b, 8, LANE), out_map),
                pl.BlockSpec((b, 8, LANE), out_map),
            ),
        ),
        compiler_params=pltpu.CompilerParams(
            dimension_semantics=("arbitrary",),
            vmem_limit_bytes=vmem_limit,
        ),
    )(p3, t3)

    # Tiny finalize in plain JAX: sublane + lane reduce, dice ratio, mean.
    inter_b = jnp.sum(inter, axis=(1, 2))        # (B,)
    pt_b = jnp.sum(pt, axis=(1, 2))              # (B,) = sum(p) + sum(t)
    dice = (2.0 * inter_b) / (pt_b + smooth)
    return 1.0 - jnp.mean(dice)


def _dice_loss_ref(preds, targets, smooth=1e-6):
    inter_b, pt_b = _dice_sums_ref(preds, targets)
    return 1.0 - jnp.mean(2.0 * inter_b / (pt_b + smooth))


if __name__ == "__main__":
    key = jax.random.PRNGKey(0)
    k1, k2, k3, k4 = jax.random.split(key, 4)

    # Case 1: lane-aligned small input (B=2, C=4, H=W=16), forced onto Pallas.
    p1 = jax.random.normal(k1, (2, 4, 16, 16), dtype=jnp.float32)
    t1 = (jax.random.uniform(k2, (2, 4, 16, 16)) > 0.5).astype(jnp.float32)
    out1 = jax.block_until_ready(dice_loss(p1, t1, min_kernel_elems=0))
    ref1 = _dice_loss_ref(p1, t1)
    assert jnp.allclose(out1, ref1, atol=1e-5, rtol=1e-5), (out1, ref1)

    # Case 2: ragged feature count (exercises in-kernel tail masking).
    p2 = jax.random.normal(k3, (2, 3, 10, 10), dtype=jnp.float32)
    t2 = (jax.random.uniform(k4, (2, 3, 10, 10)) > 0.5).astype(jnp.float32)
    out2 = jax.block_until_ready(dice_loss(p2, t2, min_kernel_elems=0))
    ref2 = _dice_loss_ref(p2, t2)
    assert jnp.allclose(out2, ref2, atol=1e-5, rtol=1e-5), (out2, ref2)

    # Case 3: multi-step grid accumulation (tiny forced block -> 4 steps).
    p3 = jax.random.normal(k1, (2, 4, 32, 32), dtype=jnp.float32)
    t3 = (jax.random.uniform(k2, (2, 4, 32, 32)) > 0.5).astype(jnp.float32)
    out3 = jax.block_until_ready(
        dice_loss(p3, t3, min_kernel_elems=0, target_block_bytes=8 * 1024))
    ref3 = _dice_loss_ref(p3, t3)
    assert jnp.allclose(out3, ref3, atol=1e-5, rtol=1e-5), (out3, ref3)

    # Case 4: default small-input fast path (pure JAX, no kernel launch).
    out4 = jax.block_until_ready(dice_loss(p1, t1))
    assert jnp.allclose(out4, ref1, atol=1e-5, rtol=1e-5), (out4, ref1)

    print("KERNEL_OK")
</pallas_src>

<mosaic_0001>
module attributes {stable_mosaic.version = 11 : i64} {
  func.func @_dice_kernel(%arg0: i32, %arg1: memref<2x8x128xf32, #tpu.memory_space<vmem>>, %arg2: memref<2x8x128xf32, #tpu.memory_space<vmem>>, %arg3: memref<2x8x128xf32, #tpu.memory_space<vmem>>, %arg4: memref<2x8x128xf32, #tpu.memory_space<vmem>>) attributes {dimension_semantics = [#tpu.dimension_semantics<arbitrary>], iteration_bounds = array<i64: 1>, scalar_prefetch = 0 : i64, scratch_operands = 0 : i64, tpu.core_type = #tpu.core_type<tc>, window_params = [{transform_indices = @transform_0, window_bounds = array<i64: 2, 8, 128>}, {transform_indices = @transform_1, window_bounds = array<i64: 2, 8, 128>}, {pipeline_mode = #tpu.pipeline_mode<synchronous>, transform_indices = @transform_2, window_bounds = array<i64: 2, 8, 128>}, {pipeline_mode = #tpu.pipeline_mode<synchronous>, transform_indices = @transform_3, window_bounds = array<i64: 2, 8, 128>}]} {
    %c0_i32 = arith.constant 0 : i32
    %0 = arith.cmpi eq, %arg0, %c0_i32 : i32
    %1 = arith.extui %0 : i1 to i32
    %c0_i32_0 = arith.constant 0 : i32
    %2 = arith.cmpi ne, %1, %c0_i32_0 : i32
    scf.if %2 {
      %cst_22 = arith.constant 0.000000e+00 : f32
      %24 = vector.broadcast %cst_22 : f32 to vector<2x8x128xf32>
      %c0_23 = arith.constant 0 : index
      %c0_24 = arith.constant 0 : index
      %c0_25 = arith.constant 0 : index
      %25 = vector.load %arg3[%c0_23, %c0_24, %c0_25] : memref<2x8x128xf32, #tpu.memory_space<vmem>>, vector<2x8x128xf32>
      tpu.vector_store %arg3[%c0_23, %c0_24, %c0_25], %24 {strides = array<i32>} : memref<2x8x128xf32, #tpu.memory_space<vmem>>, vector<2x8x128xf32>,
      %cst_26 = arith.constant 0.000000e+00 : f32
      %26 = vector.broadcast %cst_26 : f32 to vector<2x8x128xf32>
      %c0_27 = arith.constant 0 : index
      %c0_28 = arith.constant 0 : index
      %c0_29 = arith.constant 0 : index
      %27 = vector.load %arg4[%c0_27, %c0_28, %c0_29] : memref<2x8x128xf32, #tpu.memory_space<vmem>>, vector<2x8x128xf32>
      tpu.vector_store %arg4[%c0_27, %c0_28, %c0_29], %26 {strides = array<i32>} : memref<2x8x128xf32, #tpu.memory_space<vmem>>, vector<2x8x128xf32>,
    } else {
    }
    %c0 = arith.constant 0 : index
    %c0_1 = arith.constant 0 : index
    %c0_2 = arith.constant 0 : index
    %3 = vector.load %arg1[%c0, %c0_1, %c0_2] : memref<2x8x128xf32, #tpu.memory_space<vmem>>, vector<2x8x128xf32>
    %c0_3 = arith.constant 0 : index
    %c0_4 = arith.constant 0 : index
    %c0_5 = arith.constant 0 : index
    %4 = vector.load %arg2[%c0_3, %c0_4, %c0_5] : memref<2x8x128xf32, #tpu.memory_space<vmem>>, vector<2x8x128xf32>
    %cst = arith.constant 5.000000e-01 : f32
    %5 = vector.broadcast %cst : f32 to vector<2x8x128xf32>
    %6 = arith.mulf %5, %3 : vector<2x8x128xf32>
    %7 = math.tanh %6 : vector<2x8x128xf32>
    %cst_6 = arith.constant 1.000000e+00 : f32
    %8 = vector.broadcast %cst_6 : f32 to vector<2x8x128xf32>
    %9 = arith.addf %7, %8 : vector<2x8x128xf32>
    %cst_7 = arith.constant 5.000000e-01 : f32
    %10 = vector.broadcast %cst_7 : f32 to vector<2x8x128xf32>
    %11 = arith.mulf %10, %9 : vector<2x8x128xf32>
    %c0_8 = arith.constant 0 : index
    %c0_9 = arith.constant 0 : index
    %c0_10 = arith.constant 0 : index
    %12 = vector.load %arg3[%c0_8, %c0_9, %c0_10] : memref<2x8x128xf32, #tpu.memory_space<vmem>>, vector<2x8x128xf32>
    %13 = arith.mulf %11, %4 : vector<2x8x128xf32>
    %14 = vector.shape_cast %13 : vector<2x8x128xf32> to vector<2x1x8x128xf32>
    %cst_11 = arith.constant dense<0.000000e+00> : vector<2x8x128xf32>
    %15 = vector.multi_reduction <add>, %14, %cst_11 [1] : vector<2x1x8x128xf32> to vector<2x8x128xf32>
    %16 = arith.addf %12, %15 : vector<2x8x128xf32>
    %c0_12 = arith.constant 0 : index
    %c0_13 = arith.constant 0 : index
    %c0_14 = arith.constant 0 : index
    %17 = vector.load %arg3[%c0_12, %c0_13, %c0_14] : memref<2x8x128xf32, #tpu.memory_space<vmem>>, vector<2x8x128xf32>
    tpu.vector_store %arg3[%c0_12, %c0_13, %c0_14], %16 {strides = array<i32>} : memref<2x8x128xf32, #tpu.memory_space<vmem>>, vector<2x8x128xf32>,
    %c0_15 = arith.constant 0 : index
    %c0_16 = arith.constant 0 : index
    %c0_17 = arith.constant 0 : index
    %18 = vector.load %arg4[%c0_15, %c0_16, %c0_17] : memref<2x8x128xf32, #tpu.memory_space<vmem>>, vector<2x8x128xf32>
    %19 = arith.addf %11, %4 : vector<2x8x128xf32>
    %20 = vector.shape_cast %19 : vector<2x8x128xf32> to vector<2x1x8x128xf32>
    %cst_18 = arith.constant dense<0.000000e+00> : vector<2x8x128xf32>
    %21 = vector.multi_reduction <add>, %20, %cst_18 [1] : vector<2x1x8x128xf32> to vector<2x8x128xf32>
    %22 = arith.addf %18, %21 : vector<2x8x128xf32>
    %c0_19 = arith.constant 0 : index
    %c0_20 = arith.constant 0 : index
    %c0_21 = arith.constant 0 : index
    %23 = vector.load %arg4[%c0_19, %c0_20, %c0_21] : memref<2x8x128xf32, #tpu.memory_space<vmem>>, vector<2x8x128xf32>
    tpu.vector_store %arg4[%c0_19, %c0_20, %c0_21], %22 {strides = array<i32>} : memref<2x8x128xf32, #tpu.memory_space<vmem>>, vector<2x8x128xf32>,
    return
  }
  func.func @transform_0(%arg0: i32) -> (i32, i32, i32) {
    %c0_i32 = arith.constant 0 : i32
    %c0_i32_0 = arith.constant 0 : i32
    %c0_i32_1 = arith.constant 0 : i32
    return %c0_i32, %arg0, %c0_i32_0 : i32, i32, i32
  }
  func.func @transform_1(%arg0: i32) -> (i32, i32, i32) {
    %c0_i32 = arith.constant 0 : i32
    %c0_i32_0 = arith.constant 0 : i32
    %c0_i32_1 = arith.constant 0 : i32
    return %c0_i32, %arg0, %c0_i32_0 : i32, i32, i32
  }
  func.func @transform_2(%arg0: i32) -> (i32, i32, i32) {
    %c0_i32 = arith.constant 0 : i32
    %c0_i32_0 = arith.constant 0 : i32
    %c0_i32_1 = arith.constant 0 : i32
    %c0_i32_2 = arith.constant 0 : i32
    return %c0_i32, %c0_i32_0, %c0_i32_1 : i32, i32, i32
  }
  func.func @transform_3(%arg0: i32) -> (i32, i32, i32) {
    %c0_i32 = arith.constant 0 : i32
    %c0_i32_0 = arith.constant 0 : i32
    %c0_i32_1 = arith.constant 0 : i32
    %c0_i32_2 = arith.constant 0 : i32
    return %c0_i32, %c0_i32_0, %c0_i32_1 : i32, i32, i32
  }
}

</mosaic_0001>

<bundles_post_ra>
// kernel: tpu_custom_call.1
= control target key start
LH: loop header
LB: loop body
LE: loop exit
PB: predicated region body
PF: predicated region fallthrough
CT: control target
= control target key end

     0   :  { %9 = vsyncpa [#allocation3], 0  ;;  %s290_s0 = inlined_call_operand.hbm [shape: f32[2,8,128], index: 0, kind: input, shape index: {}]   ;;  %s291_s1 = inlined_call_operand.hbm [shape: f32[2,8,128], index: 1, kind: input, shape index: {}]   ;;  %s292_s2 = inlined_call_operand.hbm [shape: f32[2,8,128], index: 2, kind: output, shape index: {0}]   ;;  %s293_s3 = inlined_call_operand.hbm [shape: f32[2,8,128], index: 3, kind: output, shape index: {1}]  }
   0x1   :  { %10 = vsyncpa [#allocation6], 0 }
   0x2   :  { %11 = vsyncpa [#allocation4], 0 }
   0x3   :  { %12 = vsyncpa [#allocation9], 0  ;;  %s17_s14 = sshll.u32 %s290_s0, 4  ;;  %s240_s15 = smov [#allocation2]   ;;  %s18_s14 = int_to_ptr.hbm [resolvable:$true] %s17_s14 }
   0x4   :  { %s19_s16 = sshll.u32 %s240_s15, 4  ;;  %s30_s19 = sshll.u32 %s291_s1, 4  ;;  %s20_s16 = int_to_ptr.vmem [resolvable:$true] %s19_s16  ;;  %s31_s19 = int_to_ptr.hbm [resolvable:$true] %s30_s19 }
   0x5   :  { %s241_s20 = smov 128   ;;  %s242_s21 = smov 8  }
   0x6   :  { %25 = dma.hbm_to_vmem [thread:$0]  %s18_s14, 256, %s20_s16, [#allocation3], %s241_s20, %s241_s20, %s242_s21  }
   0x7   :  { %s243_s22 = smov [#allocation5]  }
   0x8   :  { %s32_s23 = sshll.u32 %s243_s22, 4  ;;  %s33_s23 = int_to_ptr.vmem [resolvable:$true] %s32_s23 }
   0x9   :  { %38 = dma.hbm_to_vmem [thread:$0]  %s31_s19, 256, %s33_s23, [#allocation6], %s241_s20, %s241_s20, %s242_s21  }
   0xa   :  { %232 = dma.done.wait [#allocation3], 256  }
   0xb   :  { %233 = vsyncadd [#allocation3], 4294967040 }
   0xc   :  { %234 = dma.done.wait [#allocation6], 256  }
   0xd   :  { %235 = vsyncadd [#allocation6], 4294967040  ;;  %v55_v0 = vld [vmem:[#allocation2] sm:$0xff]  ;;  %v56_v1 = vld [vmem:[#allocation2 + $0x8] sm:$0xff]  ;;  %s244_s0 = smov [#allocation7]   ;;  %s93_s26 = sshll.u32 %s292_s2, 4  ;;  %s94_s26 = int_to_ptr.hbm [resolvable:$true] %s93_s26 }
   0xe   :  { %v59_v2 = vmul.f32 0.5, %v55_v0  ;;  %v60_v3 = vmul.f32 0.5, %v56_v1  ;;  %v57_v7 = vld [vmem:[#allocation5] sm:$0xff]  ;;  %v58_v10 = vld [vmem:[#allocation5 + $0x8] sm:$0xff]  ;;  %s91_s1 = sshll.u32 %s244_s0, 4  ;;  %s245_s27 = smov [#allocation8]   ;;  %s92_s1 = int_to_ptr.vmem [resolvable:$true] %s91_s1 }
   0xf   :  { %s104_s28 = sshll.u32 %s245_s27, 4  ;;  %s106_s4 = sshll.u32 %s293_s3, 4  ;;  %s105_s28 = int_to_ptr.vmem [resolvable:$true] %s104_s28  ;;  %s107_s4 = int_to_ptr.hbm [resolvable:$true] %s106_s4 }
  0x10   :  { %132 = vtanh.f32 %v59_v2 }
  0x11   :  { %134 = vtanh.f32 %v60_v3 }
  0x16   :  { %v133_v4 = vpop.eup %132 }
  0x17   :  { %v135_v5 = vpop.eup %134  ;;  %v63_v6 = vadd.f32 1.0, %v133_v4 }
  0x18   :  { %v64_v8 = vadd.f32 1.0, %v135_v5 }
  0x19   :  { %v65_v9 = vmul.f32 0.5, %v63_v6 }
  0x1a   :  { %v66_v11 = vmul.f32 0.5, %v64_v8 }
  0x1b   :  { %v69_v12 = vmul.f32 %v65_v9, %v57_v7  ;;  %v79_v13 = vadd.f32 %v65_v9, %v57_v7 }
  0x1c   :  { %v70_v14 = vmul.f32 %v66_v11, %v58_v10  ;;  %v80_v15 = vadd.f32 %v66_v11, %v58_v10 }
  0x1d   :  { %75 = vst [vmem:[#allocation7] sm:$0xff] %v69_v12 }
  0x1e   :  { %76 = vst [vmem:[#allocation7 + $0x8] sm:$0xff] %v70_v14 }
  0x1f   :  { %85 = vst [vmem:[#allocation8] sm:$0xff] %v79_v13  ;;  %99 = dma.vmem_to_hbm [thread:$0]  %s92_s1, 256, %s94_s26, [#allocation4], %s241_s20, %s241_s20, %s242_s21  }
  0x20   :  { %86 = vst [vmem:[#allocation8 + $0x8] sm:$0xff] %v80_v15 }
  0x21   :  { %112 = dma.vmem_to_hbm [thread:$0]  %s105_s28, 256, %s107_s4, [#allocation9], %s241_s20, %s241_s20, %s242_s21  }
  0x22   :  { %236 = dma.done.wait [#allocation4], 256  }
  0x23   :  { %237 = vsyncadd [#allocation4], 4294967040 }
  0x24   :  { %238 = dma.done.wait [#allocation9], 256  }
  0x25   :  { %239 = vsyncadd [#allocation9], 4294967040 }
  0x26   :  { %121 = vsyncpa [#allocation3], 1 }
  0x27   :  { %122 = vsyncpa [#allocation6], 1 }
  0x28   :  { %123 = vsyncpa [#allocation4], 1 }
  0x29   :  { %124 = vsyncpa [#allocation9], 1 }

</bundles_post_ra>
